<compile_context>
chip_gen: v5e
topology: v5e:2x2
jax: 0.10.0
libtpu: 0.0.40
codegen_flags: <defaults>
</compile_context>

<pallas_src>
import functools

import jax
import jax.numpy as jnp
from jax.experimental import pallas as pl
from jax.experimental.pallas import tpu as pltpu


def _round_up(x: int, m: int) -> int:
    return ((x + m - 1) // m) * m


def _pad_dim(d: int) -> int:
    # Lane-dense padding.  Dims that already exceed one 128-lane vreg are
    # padded to the 256-wide MXU granularity (v6e/v7x); small dims stay at 128.
    return _round_up(d, 128) if d <= 128 else _round_up(d, 256)


def _choose_row_tiling(n: int):
    """Pick (tile_n, n_padded).  >=2 parallel grid steps when n > 256 so both
    v7x TensorCores get work; a single tile for tiny token counts."""
    if n <= 256:
        tile_n = max(_round_up(n, 8), 8)
        return tile_n, tile_n
    if n <= 1024:
        tile_n = _round_up((n + 1) // 2, 8)
        return tile_n, 2 * tile_n
    tile_n = 512
    return tile_n, _round_up(n, tile_n)


def _vmem_cap_bytes() -> int:
    """Generation-aware VMEM request cap (physical capacity minus headroom)."""
    try:
        cap = pltpu.get_tpu_info().vmem_capacity_bytes
    except Exception:
        cap = 64 << 20
    return max(cap - (16 << 20), 16 << 20)


@functools.lru_cache(maxsize=None)
def _buffered_one_supported() -> bool:
    """Probe whether pipeline_mode=pl.Buffered(1) is accepted by this jax/Mosaic."""
    def k(x_ref, o_ref):
        o_ref[...] = x_ref[...]
    try:
        fn = pl.pallas_call(
            k,
            out_shape=jax.ShapeDtypeStruct((8, 128), jnp.float32),
            grid=(1,),
            in_specs=[pl.BlockSpec((8, 128), lambda i: (0, 0),
                                   pipeline_mode=pl.Buffered(1))],
            out_specs=pl.BlockSpec((8, 128), lambda i: (0, 0)),
        )
        jax.block_until_ready(fn(jnp.zeros((8, 128), jnp.float32)))
        return True
    except Exception:
        return False


def _fused_mlp_kernel(x_ref, w_ref, b_ref, o_ref, *,
                      dims_in_p, dims_out_p, sigmoid_output, matmul_dtype):
    """Fused MLP forward for one row tile.

    x_ref : (TILE_N, d_in_p)        input tile (zero-padded, lane-dense)
    w_ref : (L, wd_in, wd_out)      stacked padded weights, (in, out) layout
    b_ref : (L, 1, wd_out)          stacked padded biases
    o_ref : (TILE_N, d_out_p)       output tile (padded only to output width)
    """
    num_layers = len(dims_in_p)
    # Activation carried as a value (vregs / compiler-managed) -- no forced
    # full-tile VMEM store + reload per layer.
    h = x_ref[...].astype(jnp.float32)
    for i in range(num_layers):                 # static unroll (num_layers small)
        din, dout = dims_in_p[i], dims_out_p[i]
        # Static sub-block slices: only layer i's real padded extent is loaded
        # and pushed through the MXU (no wasted pushes on zero columns).
        w = w_ref[i, :din, :dout]
        b = b_ref[i, :, :dout]
        a = h
        if matmul_dtype is not None:
            a = a.astype(matmul_dtype)
            w = w.astype(matmul_dtype)          # no-op when weights stored as such
        y = jnp.dot(a, w, preferred_element_type=jnp.float32)
        y = y + b.astype(jnp.float32)           # bias + activation in f32
        if i < num_layers - 1:
            h = jnp.maximum(y, 0.0)
        else:
            if sigmoid_output:
                y = jax.nn.sigmoid(y)
            o_ref[...] = y.astype(o_ref.dtype)


def fused_mlp_pallas(x_pad, w_stack, b_stack, out_dtype, *, dims_in_p, dims_out_p,
                     sigmoid_output, tile_n, matmul_dtype=None, cost_estimate=None):
    """x_pad: (N_p, d_in_p), w_stack: (L, wd_in, wd_out), b_stack: (L, 1, wd_out)."""
    n_p, d_in_p = x_pad.shape
    num_layers, wd_in, wd_out = w_stack.shape
    d_out_p = dims_out_p[-1]
    assert n_p % tile_n == 0
    assert d_in_p == dims_in_p[0]

    kernel = functools.partial(
        _fused_mlp_kernel,
        dims_in_p=tuple(dims_in_p),
        dims_out_p=tuple(dims_out_p),
        sigmoid_output=sigmoid_output,
        matmul_dtype=matmul_dtype,
    )

    use_buf1 = _buffered_one_supported()
    if use_buf1:
        w_spec = pl.BlockSpec((num_layers, wd_in, wd_out), lambda i: (0, 0, 0),
                              pipeline_mode=pl.Buffered(1))
        b_spec = pl.BlockSpec((num_layers, 1, wd_out), lambda i: (0, 0, 0),
                              pipeline_mode=pl.Buffered(1))
        w_buf_count = 1
    else:
        w_spec = pl.BlockSpec((num_layers, wd_in, wd_out), lambda i: (0, 0, 0))
        b_spec = pl.BlockSpec((num_layers, 1, wd_out), lambda i: (0, 0, 0))
        w_buf_count = 2

    # VMEM budget: x/out row tiles double-buffered, weight/bias stacks
    # single-buffered (constant index_map), plus headroom for the f32
    # activations the compiler keeps live across the unrolled layers.
    x_bytes = tile_n * d_in_p * x_pad.dtype.itemsize
    o_bytes = tile_n * d_out_p * jnp.dtype(out_dtype).itemsize
    w_bytes = (w_stack.size * w_stack.dtype.itemsize
               + b_stack.size * b_stack.dtype.itemsize)
    act_bytes = 2 * tile_n * max(max(dims_in_p), max(dims_out_p)) * 4
    vmem_need = 2 * x_bytes + 2 * o_bytes + w_buf_count * w_bytes + act_bytes
    # Always set the limit explicitly (v5e default scoped VMEM is only 16 MiB),
    # with a floor so tiny kernels don't starve compiler-internal scratch.
    vmem_limit = min(max(int(vmem_need * 1.25), 32 << 20), _vmem_cap_bytes())

    return pl.pallas_call(
        kernel,
        out_shape=jax.ShapeDtypeStruct((n_p, d_out_p), out_dtype),
        grid=(n_p // tile_n,),
        in_specs=[
            pl.BlockSpec((tile_n, d_in_p), lambda i: (i, 0)),   # x row tile
            w_spec,                                             # weights resident
            b_spec,                                             # biases resident
        ],
        out_specs=pl.BlockSpec((tile_n, d_out_p), lambda i: (i, 0)),
        compiler_params=pltpu.CompilerParams(
            dimension_semantics=("parallel",),
            vmem_limit_bytes=vmem_limit,
        ),
        cost_estimate=cost_estimate,
    )(x_pad, w_stack, b_stack)


@functools.partial(jax.jit, static_argnames=(
    "input_dim", "output_dim", "dims_in", "dims_out", "dims_in_p", "dims_out_p",
    "sigmoid_output", "matmul_dtype", "out_dtype"))
def _mlp_forward(xf, w_stack, b_stack, *, input_dim, output_dim,
                 dims_in, dims_out, dims_in_p, dims_out_p,
                 sigmoid_output, matmul_dtype, out_dtype):
    n = xf.shape[0]
    d_in_p = dims_in_p[0]
    d_out_p = dims_out_p[-1]
    tile_n, n_p = _choose_row_tiling(n)

    # Skip the wrapper-side pad entirely when the input is already kernel-shaped;
    # under this jit the pad/slice otherwise fuse with neighboring ops.
    if n == n_p and xf.shape[1] == d_in_p:
        x_pad = xf
    else:
        x_pad = jnp.zeros((n_p, d_in_p), xf.dtype)
        x_pad = x_pad.at[:n, :input_dim].set(xf)

    flops = sum(2 * n * di * do for di, do in zip(dims_in, dims_out))
    transcendentals = n * output_dim if sigmoid_output else 0
    bytes_accessed = (n_p * d_in_p * x_pad.dtype.itemsize
                      + n_p * d_out_p * jnp.dtype(out_dtype).itemsize
                      + w_stack.size * w_stack.dtype.itemsize
                      + b_stack.size * b_stack.dtype.itemsize)
    cost = pl.CostEstimate(flops=flops, transcendentals=transcendentals,
                           bytes_accessed=bytes_accessed)

    out_pad = fused_mlp_pallas(
        x_pad, w_stack, b_stack, out_dtype,
        dims_in_p=dims_in_p, dims_out_p=dims_out_p,
        sigmoid_output=sigmoid_output, tile_n=tile_n,
        matmul_dtype=matmul_dtype, cost_estimate=cost)

    if n == n_p and output_dim == d_out_p:
        return out_pad
    return out_pad[:n, :output_dim]


class MLP:
    """JAX/Pallas re-implementation of segment_anything's MLP module."""

    def __init__(self, input_dim, hidden_dim, output_dim, num_layers,
                 sigmoid_output=False, key=None, dtype=jnp.float32):
        self.num_layers = num_layers
        self.sigmoid_output = sigmoid_output
        self.input_dim = input_dim
        self.output_dim = output_dim
        self.dtype = dtype

        h = [hidden_dim] * (num_layers - 1)
        self.dims_in = tuple([input_dim] + h)
        self.dims_out = tuple(h + [output_dim])
        self.dims_in_p = tuple(_pad_dim(d) for d in self.dims_in)
        self.dims_out_p = tuple(_pad_dim(d) for d in self.dims_out)
        wd_in = max(self.dims_in_p)
        wd_out = max(self.dims_out_p)

        if key is None:
            key = jax.random.PRNGKey(0)

        self.weights_t = []   # unpadded (in, out), for the pure-JAX reference
        self.biases = []
        w_stack, b_stack = [], []
        for li, (n_in, n_out) in enumerate(zip(self.dims_in, self.dims_out)):
            wkey = jax.random.fold_in(key, 2 * li)
            bkey = jax.random.fold_in(key, 2 * li + 1)
            bound = 1.0 / (n_in ** 0.5)          # nn.Linear default init range
            w = jax.random.uniform(wkey, (n_out, n_in), dtype, -bound, bound)
            b = jax.random.uniform(bkey, (n_out,), dtype, -bound, bound)
            w_t = jnp.transpose(w)               # (in, out) so y = x @ W
            self.weights_t.append(w_t)
            self.biases.append(b)
            # Zero padding => padded rows/cols contribute exactly zero.
            w_pad = jnp.zeros((wd_in, wd_out), dtype).at[:n_in, :n_out].set(w_t)
            b_pad = jnp.zeros((1, wd_out), dtype).at[0, :n_out].set(b)
            w_stack.append(w_pad)
            b_stack.append(b_pad)
        self.w_stack = jnp.stack(w_stack)        # (L, wd_in, wd_out)
        self.b_stack = jnp.stack(b_stack)        # (L, 1, wd_out)
        # bf16 copy: native MXU rate + half the resident weight VMEM/DMA on
        # v5e/v6e/v7x.  Cast once here instead of per grid step in the kernel.
        self.w_stack_bf16 = self.w_stack.astype(jnp.bfloat16)

    def __call__(self, x, matmul_dtype=None):
        lead = x.shape[:-1]
        xf = jnp.reshape(x, (-1, x.shape[-1]))
        w_stack = (self.w_stack_bf16 if matmul_dtype == jnp.bfloat16
                   else self.w_stack)
        out = _mlp_forward(
            xf.astype(self.dtype), w_stack, self.b_stack,
            input_dim=self.input_dim, output_dim=self.output_dim,
            dims_in=self.dims_in, dims_out=self.dims_out,
            dims_in_p=self.dims_in_p, dims_out_p=self.dims_out_p,
            sigmoid_output=self.sigmoid_output,
            matmul_dtype=matmul_dtype, out_dtype=self.dtype)
        return jnp.reshape(out, (*lead, self.output_dim))


def _reference(x, weights_t, biases, num_layers, sigmoid_output):
    lead = x.shape[:-1]
    xf = x.reshape(-1, x.shape[-1])
    for i in range(num_layers):
        xf = xf @ weights_t[i] + biases[i]
        if i < num_layers - 1:
            xf = jnp.maximum(xf, 0.0)
    if sigmoid_output:
        xf = jax.nn.sigmoid(xf)
    return xf.reshape(*lead, xf.shape[-1])


if __name__ == "__main__":
    key = jax.random.PRNGKey(0)
    # Small shapes consistent with the module: (batch, tokens, input_dim)
    batch, tokens = 2, 8
    input_dim, hidden_dim, output_dim, num_layers = 32, 64, 16, 3

    xkey, pkey = jax.random.split(key)
    x = jax.random.normal(xkey, (batch, tokens, input_dim), jnp.float32)

    mlp = MLP(input_dim, hidden_dim, output_dim, num_layers,
              sigmoid_output=True, key=pkey)

    ref = _reference(x, mlp.weights_t, mlp.biases, num_layers, True)

    # Exact (f32 MXU) path.
    out = jax.block_until_ready(mlp(x))
    assert out.shape == (batch, tokens, output_dim)
    assert jnp.allclose(out, ref, atol=1e-5, rtol=1e-5)

    # bf16-operand MXU fast path (perf default for v5e/v6e/v7x); f32 accumulate,
    # looser tolerance against the f32 reference.
    out_bf16 = jax.block_until_ready(mlp(x, matmul_dtype=jnp.bfloat16))
    assert out_bf16.shape == (batch, tokens, output_dim)
    assert jnp.allclose(out_bf16, ref, atol=5e-2, rtol=5e-2)

    print("KERNEL_OK")
</pallas_src>

<mosaic_0001>
module attributes {stable_mosaic.version = 11 : i64} {
  func.func @_fused_mlp_kernel(%arg0: i32, %arg1: memref<16x128xf32, #tpu.memory_space<vmem>>, %arg2: memref<3x128x128xf32, #tpu.memory_space<vmem>>, %arg3: memref<3x1x128xf32, #tpu.memory_space<vmem>>, %arg4: memref<16x128xf32, #tpu.memory_space<vmem>>) attributes {dimension_semantics = [#tpu.dimension_semantics<parallel>], iteration_bounds = array<i64: 1>, scalar_prefetch = 0 : i64, scratch_operands = 0 : i64, tpu.core_type = #tpu.core_type<tc>, window_params = [{transform_indices = @transform_0, window_bounds = array<i64: 16, 128>}, {pipeline_mode = #tpu.pipeline_mode<synchronous>, transform_indices = @transform_1, window_bounds = array<i64: 3, 128, 128>}, {pipeline_mode = #tpu.pipeline_mode<synchronous>, transform_indices = @transform_2, window_bounds = array<i64: 3, 1, 128>}, {transform_indices = @transform_3, window_bounds = array<i64: 16, 128>}]} {
    %c0 = arith.constant 0 : index
    %c0_0 = arith.constant 0 : index
    %0 = vector.load %arg1[%c0, %c0_0] : memref<16x128xf32, #tpu.memory_space<vmem>>, vector<16x128xf32>
    %c0_1 = arith.constant 0 : index
    %c0_2 = arith.constant 0 : index
    %c0_3 = arith.constant 0 : index
    %1 = vector.load %arg2[%c0_1, %c0_2, %c0_3] : memref<3x128x128xf32, #tpu.memory_space<vmem>>, vector<1x128x128xf32>
    %2 = vector.shape_cast %1 : vector<1x128x128xf32> to vector<128x128xf32>
    %c0_4 = arith.constant 0 : index
    %c0_5 = arith.constant 0 : index
    %c0_6 = arith.constant 0 : index
    %3 = vector.load %arg3[%c0_4, %c0_5, %c0_6] : memref<3x1x128xf32, #tpu.memory_space<vmem>>, vector<1x1x128xf32>
    %4 = vector.shape_cast %3 : vector<1x1x128xf32> to vector<1x128xf32>
    %cst = arith.constant dense<0.000000e+00> : vector<16x128xf32>
    %5 = tpu.matmul %0, %2, %cst {dimension_numbers = #tpu.dot_dimension_numbers<[1], [0], [0], [1], [0, 0, 1, 1], [], []>} : vector<16x128xf32>, vector<128x128xf32>, vector<16x128xf32> -> vector<16x128xf32>
    %6 = vector.broadcast %4 : vector<1x128xf32> to vector<16x128xf32>
    %7 = arith.addf %5, %6 : vector<16x128xf32>
    %cst_7 = arith.constant 0.000000e+00 : f32
    %8 = vector.broadcast %cst_7 : f32 to vector<16x128xf32>
    %9 = arith.maximumf %7, %8 : vector<16x128xf32>
    %c1 = arith.constant 1 : index
    %c0_8 = arith.constant 0 : index
    %c0_9 = arith.constant 0 : index
    %10 = vector.load %arg2[%c1, %c0_8, %c0_9] : memref<3x128x128xf32, #tpu.memory_space<vmem>>, vector<1x128x128xf32>
    %11 = vector.shape_cast %10 : vector<1x128x128xf32> to vector<128x128xf32>
    %c1_10 = arith.constant 1 : index
    %c0_11 = arith.constant 0 : index
    %c0_12 = arith.constant 0 : index
    %12 = vector.load %arg3[%c1_10, %c0_11, %c0_12] : memref<3x1x128xf32, #tpu.memory_space<vmem>>, vector<1x1x128xf32>
    %13 = vector.shape_cast %12 : vector<1x1x128xf32> to vector<1x128xf32>
    %cst_13 = arith.constant dense<0.000000e+00> : vector<16x128xf32>
    %14 = tpu.matmul %9, %11, %cst_13 {dimension_numbers = #tpu.dot_dimension_numbers<[1], [0], [0], [1], [0, 0, 1, 1], [], []>} : vector<16x128xf32>, vector<128x128xf32>, vector<16x128xf32> -> vector<16x128xf32>
    %15 = vector.broadcast %13 : vector<1x128xf32> to vector<16x128xf32>
    %16 = arith.addf %14, %15 : vector<16x128xf32>
    %cst_14 = arith.constant 0.000000e+00 : f32
    %17 = vector.broadcast %cst_14 : f32 to vector<16x128xf32>
    %18 = arith.maximumf %16, %17 : vector<16x128xf32>
    %c2 = arith.constant 2 : index
    %c0_15 = arith.constant 0 : index
    %c0_16 = arith.constant 0 : index
    %19 = vector.load %arg2[%c2, %c0_15, %c0_16] : memref<3x128x128xf32, #tpu.memory_space<vmem>>, vector<1x128x128xf32>
    %20 = vector.shape_cast %19 : vector<1x128x128xf32> to vector<128x128xf32>
    %c2_17 = arith.constant 2 : index
    %c0_18 = arith.constant 0 : index
    %c0_19 = arith.constant 0 : index
    %21 = vector.load %arg3[%c2_17, %c0_18, %c0_19] : memref<3x1x128xf32, #tpu.memory_space<vmem>>, vector<1x1x128xf32>
    %22 = vector.shape_cast %21 : vector<1x1x128xf32> to vector<1x128xf32>
    %cst_20 = arith.constant dense<0.000000e+00> : vector<16x128xf32>
    %23 = tpu.matmul %18, %20, %cst_20 {dimension_numbers = #tpu.dot_dimension_numbers<[1], [0], [0], [1], [0, 0, 1, 1], [], []>} : vector<16x128xf32>, vector<128x128xf32>, vector<16x128xf32> -> vector<16x128xf32>
    %24 = vector.broadcast %22 : vector<1x128xf32> to vector<16x128xf32>
    %25 = arith.addf %23, %24 : vector<16x128xf32>
    %26 = arith.negf %25 : vector<16x128xf32>
    %27 = math.exp %26 : vector<16x128xf32>
    %cst_21 = arith.constant 1.000000e+00 : f32
    %28 = vector.broadcast %cst_21 : f32 to vector<16x128xf32>
    %29 = arith.addf %28, %27 : vector<16x128xf32>
    %30 = arith.divf %28, %29 : vector<16x128xf32>
    %c0_22 = arith.constant 0 : index
    %c0_23 = arith.constant 0 : index
    %31 = vector.load %arg4[%c0_22, %c0_23] : memref<16x128xf32, #tpu.memory_space<vmem>>, vector<16x128xf32>
    tpu.vector_store %arg4[%c0_22, %c0_23], %30 {strides = array<i32>} : memref<16x128xf32, #tpu.memory_space<vmem>>, vector<16x128xf32>,
    return
  }
  func.func @transform_0(%arg0: i32) -> (i32, i32) {
    %c0_i32 = arith.constant 0 : i32
    %c0_i32_0 = arith.constant 0 : i32
    return %arg0, %c0_i32 : i32, i32
  }
  func.func @transform_1(%arg0: i32) -> (i32, i32, i32) {
    %c0_i32 = arith.constant 0 : i32
    %c0_i32_0 = arith.constant 0 : i32
    %c0_i32_1 = arith.constant 0 : i32
    %c0_i32_2 = arith.constant 0 : i32
    return %c0_i32, %c0_i32_0, %c0_i32_1 : i32, i32, i32
  }
  func.func @transform_2(%arg0: i32) -> (i32, i32, i32) {
    %c0_i32 = arith.constant 0 : i32
    %c0_i32_0 = arith.constant 0 : i32
    %c0_i32_1 = arith.constant 0 : i32
    %c0_i32_2 = arith.constant 0 : i32
    return %c0_i32, %c0_i32_0, %c0_i32_1 : i32, i32, i32
  }
  func.func @transform_3(%arg0: i32) -> (i32, i32) {
    %c0_i32 = arith.constant 0 : i32
    %c0_i32_0 = arith.constant 0 : i32
    return %arg0, %c0_i32 : i32, i32
  }
}

</mosaic_0001>

<bundles_post_ra>
// kernel: _mlp_forward.1
= control target key start
LH: loop header
LB: loop body
LE: loop exit
PB: predicated region body
PF: predicated region fallthrough
CT: control target
= control target key end

     0   :  { %8 = vsyncpa [#allocation3], 0  ;;  %s367_s0 = inlined_call_operand.vmem [shape: f32[16,128], index: 0, kind: input, shape index: {}]   ;;  %s368_s1 = inlined_call_operand.hbm [shape: f32[3,128,128], index: 1, kind: input, shape index: {}]   ;;  %s369_s2 = inlined_call_operand.vmem [shape: f32[3,1,128], index: 2, kind: input, shape index: {}]   ;;  %s370_s3 = inlined_call_operand.hbm [shape: f32[16,128], index: 3, kind: output, shape index: {}]  }
   0x1   :  { %9 = vsyncpa [#allocation4], 0  ;;  %s16_s14 = sshll.u32 %s368_s1, 4  ;;  %s316_s15 = smov [#allocation2]   ;;  %s17_s14 = int_to_ptr.hbm [resolvable:$true] %s16_s14 }
   0x2   :  { %s18_s16 = sshll.u32 %s316_s15, 4  ;;  %s317_s17 = smov 128   ;;  %s19_s16 = int_to_ptr.vmem [resolvable:$true] %s18_s16 }
   0x3   :  { %s318_s18 = smov 8  }
   0x4   :  { %24 = dma.hbm_to_vmem [thread:$0]  %s17_s14, 6144, %s19_s16, [#allocation3], %s317_s17, %s317_s17, %s318_s18  }
   0x5   :  { %312 = dma.done.wait [#allocation3], 6144  }
   0x6   :  { %313 = vsyncadd [#allocation3], 4294961152  ;;  %v48_v0 = vld [vmem:[#allocation2 + $0x78] sm:$0xff]  ;;  %v47_v1 = vld [vmem:[#allocation2 + $0x70] sm:$0xff]  ;;  %s216_s30 = sshll.u32 %s370_s3, 4  ;;  %s217_s30 = int_to_ptr.hbm [resolvable:$true] %s216_s30 }
   0x7   :  { %53 = vmatpush.msra.mxu0 %v48_v0  ;;  %233 = vmatpush.msra.mxu3 %v48_v0  ;;  %v46_v2 = vld [vmem:[#allocation2 + $0x68] sm:$0xff]  ;;  %v45_v3 = vld [vmem:[#allocation2 + $0x60] sm:$0xff]  ;;  %v44_v4 = vld [vmem:[#allocation2 + $0x58] sm:$0xff] }
   0x8   :  { %v94_v5 = vld [vmem:[#allocation2 + $0xf8] sm:$0xff]  ;;  %v93_v6 = vld [vmem:[#allocation2 + $0xf0] sm:$0xff]  ;;  %v92_v8 = vld [vmem:[#allocation2 + $0xe8] sm:$0xff] }
   0x9   :  { %54 = vmatpush.msra.mxu0 %v47_v1  ;;  %234 = vmatpush.msra.mxu3 %v47_v1  ;;  %v43_v7 = vld [vmem:[#allocation2 + $0x50] sm:$0xff]  ;;  %v42_v9 = vld [vmem:[#allocation2 + $0x48] sm:$0xff]  ;;  %v91_v10 = vld [vmem:[#allocation2 + $0xe0] sm:$0xff] }
   0xa   :  { %100 = vmatpush.msra.mxu1 %v94_v5  ;;  %v41_v11 = vld [vmem:[#allocation2 + $0x40] sm:$0xff]  ;;  %v90_v12 = vld [vmem:[#allocation2 + $0xd8] sm:$0xff]  ;;  %v89_v14 = vld [vmem:[#allocation2 + $0xd0] sm:$0xff] }
   0xb   :  { %55 = vmatpush.msra.mxu0 %v46_v2  ;;  %235 = vmatpush.msra.mxu3 %v46_v2  ;;  %v40_v13 = vld [vmem:[#allocation2 + $0x38] sm:$0xff]  ;;  %v39_v15 = vld [vmem:[#allocation2 + $0x30] sm:$0xff]  ;;  %v88_v16 = vld [vmem:[#allocation2 + $0xc8] sm:$0xff] }
   0xc   :  { %101 = vmatpush.msra.mxu1 %v93_v6  ;;  %v38_v17 = vld [vmem:[#allocation2 + $0x28] sm:$0xff]  ;;  %v87_v18 = vld [vmem:[#allocation2 + $0xc0] sm:$0xff]  ;;  %v86_v20 = vld [vmem:[#allocation2 + $0xb8] sm:$0xff] }
   0xd   :  { %56 = vmatpush.msra.mxu0 %v45_v3  ;;  %236 = vmatpush.msra.mxu3 %v45_v3  ;;  %v37_v19 = vld [vmem:[#allocation2 + $0x20] sm:$0xff]  ;;  %v36_v21 = vld [vmem:[#allocation2 + $0x18] sm:$0xff]  ;;  %v85_v22 = vld [vmem:[#allocation2 + $0xb0] sm:$0xff] }
   0xe   :  { %102 = vmatpush.msra.mxu1 %v92_v8  ;;  %v35_v23 = vld [vmem:[#allocation2 + $0x10] sm:$0xff]  ;;  %v84_v24 = vld [vmem:[#allocation2 + $0xa8] sm:$0xff]  ;;  %v83_v26 = vld [vmem:[#allocation2 + $0xa0] sm:$0xff] }
   0xf   :  { %57 = vmatpush.msra.mxu0 %v44_v4  ;;  %237 = vmatpush.msra.mxu3 %v44_v4  ;;  %v34_v25 = vld [vmem:[#allocation2 + $0x8] sm:$0xff]  ;;  %v33_v27 = vld [vmem:[#allocation2] sm:$0xff]  ;;  %v82_v30 = vld [vmem:[#allocation2 + $0x98] sm:$0xff] }
  0x10   :  { %103 = vmatpush.msra.mxu1 %v91_v10  ;;  %v31_v28 = vld [vmem:[%s367_s0] sm:$0xff]  ;;  %v32_v29 = vld [vmem:[%s367_s0 + $0x8] sm:$0xff]  ;;  %v81_v31 = vld [vmem:[#allocation2 + $0x90] sm:$0xff] }
  0x11   :  { %58 = vmatpush.msra.mxu0 %v43_v7  ;;  %238 = vmatpush.msra.mxu3 %v43_v7  ;;  %v80_v32 = vld [vmem:[#allocation2 + $0x88] sm:$0xff]  ;;  %v79_v33 = vld [vmem:[#allocation2 + $0x80] sm:$0xff]  ;;  %v141_v34 = vld [vmem:[#allocation2 + $0x178] sm:$0xff] }
  0x12   :  { %104 = vmatpush.msra.mxu1 %v90_v12  ;;  %v140_v35 = vld [vmem:[#allocation2 + $0x170] sm:$0xff]  ;;  %147 = vmatpush.msra.mxu2 %v141_v34  ;;  %v139_v36 = vld [vmem:[#allocation2 + $0x168] sm:$0xff]  ;;  %v138_v37 = vld [vmem:[#allocation2 + $0x160] sm:$0xff] }
  0x13   :  { %59 = vmatpush.msra.mxu0 %v42_v9  ;;  %239 = vmatpush.msra.mxu3 %v42_v9  ;;  %v137_v38 = vld [vmem:[#allocation2 + $0x158] sm:$0xff]  ;;  %v136_v39 = vld [vmem:[#allocation2 + $0x150] sm:$0xff]  ;;  %v135_v40 = vld [vmem:[#allocation2 + $0x148] sm:$0xff] }
  0x14   :  { %105 = vmatpush.msra.mxu1 %v89_v14  ;;  %148 = vmatpush.msra.mxu2 %v140_v35  ;;  %v134_v41 = vld [vmem:[#allocation2 + $0x140] sm:$0xff]  ;;  %v133_v42 = vld [vmem:[#allocation2 + $0x138] sm:$0xff]  ;;  %v132_v44 = vld [vmem:[#allocation2 + $0x130] sm:$0xff] }
  0x15   :  { %60 = vmatpush.msra.mxu0 %v41_v11  ;;  %240 = vmatpush.msra.mxu3 %v41_v11  ;;  %v253_v43 = vld [vmem:[%s369_s2] ss:$0 sm:$0xff]  ;;  %v131_v45 = vld [vmem:[#allocation2 + $0x128] sm:$0xff]  ;;  %v129_v50 = vld [vmem:[#allocation2 + $0x118] sm:$0xff] }
  0x16   :  { %106 = vmatpush.msra.mxu1 %v88_v16  ;;  %149 = vmatpush.msra.mxu2 %v139_v36  ;;  %v130_v48 = vld [vmem:[#allocation2 + $0x120] sm:$0xff]  ;;  %v128_v54 = vld [vmem:[#allocation2 + $0x110] sm:$0xff]  ;;  %v127_v55 = vld [vmem:[#allocation2 + $0x108] sm:$0xff] }
  0x17   :  { %61 = vmatpush.msra.mxu0 %v40_v13  ;;  %241 = vmatpush.msra.mxu3 %v40_v13  ;;  %v126_v56 = vld [vmem:[#allocation2 + $0x100] sm:$0xff] }
  0x18   :  { %107 = vmatpush.msra.mxu1 %v87_v18  ;;  %150 = vmatpush.msra.mxu2 %v138_v37  ;;  %v254_v57 = vld [vmem:[%s369_s2 + $0x1] ss:$0 sm:$0xff]  ;;  %v255_v0 = vld [vmem:[%s369_s2 + $0x2] ss:$0 sm:$0xff]  ;;  %s319_s2 = smov [#allocation5]  }
  0x19   :  { %62 = vmatpush.msra.mxu0 %v39_v15  ;;  %242 = vmatpush.msra.mxu3 %v39_v15  ;;  %s214_s27 = sshll.u32 %s319_s2, 4  ;;  %s215_s27 = int_to_ptr.vmem [resolvable:$true] %s214_s27 }
  0x1a   :  { %108 = vmatpush.msra.mxu1 %v86_v20  ;;  %151 = vmatpush.msra.mxu2 %v137_v38 }
  0x1b   :  { %63 = vmatpush.msra.mxu0 %v38_v17  ;;  %243 = vmatpush.msra.mxu3 %v38_v17 }
  0x1c   :  { %109 = vmatpush.msra.mxu1 %v85_v22  ;;  %152 = vmatpush.msra.mxu2 %v136_v39 }
  0x1d   :  { %64 = vmatpush.msra.mxu0 %v37_v19  ;;  %244 = vmatpush.msra.mxu3 %v37_v19 }
  0x1e   :  { %110 = vmatpush.msra.mxu1 %v84_v24  ;;  %153 = vmatpush.msra.mxu2 %v135_v40 }
  0x1f   :  { %65 = vmatpush.msra.mxu0 %v36_v21  ;;  %245 = vmatpush.msra.mxu3 %v36_v21 }
  0x20   :  { %111 = vmatpush.msra.mxu1 %v83_v26  ;;  %154 = vmatpush.msra.mxu2 %v134_v41 }
  0x21   :  { %66 = vmatpush.msra.mxu0 %v35_v23  ;;  %246 = vmatpush.msra.mxu3 %v35_v23 }
  0x22   :  { %112 = vmatpush.msra.mxu1 %v82_v30  ;;  %155 = vmatpush.msra.mxu2 %v133_v42 }
  0x23   :  { %67 = vmatpush.msra.mxu0 %v34_v25  ;;  %247 = vmatpush.msra.mxu3 %v34_v25 }
  0x24   :  { %113 = vmatpush.msra.mxu1 %v81_v31  ;;  %156 = vmatpush.msra.mxu2 %v132_v44 }
  0x25   :  { %68 = vmatpush.msra.mxu0 %v33_v27  ;;  %248 = vmatpush.msra.mxu3 %v33_v27 }
  0x26   :  { %69 = vmatmul.f32.vlgmr.msra.gmra.mxu0 %v31_v28  ;;  %72 = vmatmul.f32.vlgmr.msra.gmra.mxu3 %v32_v29 }
  0x27   :  { %114 = vmatpush.msra.mxu1 %v80_v32  ;;  %157 = vmatpush.msra.mxu2 %v131_v45 }
  0x29   :  { %115 = vmatpush.msra.mxu1 %v79_v33  ;;  %158 = vmatpush.msra.mxu2 %v130_v48 }
  0x2b   :  { %159 = vmatpush.msra.mxu2 %v129_v50 }
  0x2d   :  { %160 = vmatpush.msra.mxu2 %v128_v54 }
  0x2f   :  { %161 = vmatpush.msra.mxu2 %v127_v55 }
  0x31   :  { %162 = vmatpush.msra.mxu2 %v126_v56 }
  0xa3   :  { %v70_v46 = vpop.f32.mrf.mxu0 }
  0xa4   :  { %v71_v47 = vadd.f32 %v253_v43, %v70_v46 }
  0xa6   :  { %v76_v49 = vmax.f32 %v71_v47, 0.0 }
  0xa8   :  { %116 = vmatmul.f32.vlgmr.msra.gmra.mxu1 %v76_v49 }
  0xa9   :  { %v73_v51 = vpop.f32.mrf.mxu3 }
  0xaa   :  { %v74_v52 = vadd.f32 %v253_v43, %v73_v51 }
  0xac   :  { %v77_v53 = vmax.f32 %v74_v52, 0.0 }
  0xb0   :  { %119 = vmatmul.f32.gmra.mxu1 %v77_v53 }
 0x125   :  { %v117_v58 = vpop.f32.mrf.mxu1 }
 0x126   :  { %v118_v59 = vadd.f32 %v254_v57, %v117_v58 }
 0x128   :  { %v123_v60 = vmax.f32 %v118_v59, 0.0 }
 0x12a   :  { %163 = vmatmul.f32.vlgmr.msra.gmra.mxu2 %v123_v60 }
 0x12d   :  { %v120_v61 = vpop.f32.mrf.mxu1 }
 0x12e   :  { %v121_v62 = vadd.f32 %v254_v57, %v120_v61 }
 0x130   :  { %v124_v63 = vmax.f32 %v121_v62, 0.0 }
 0x132   :  { %166 = vmatmul.f32.gmra.mxu2 %v124_v63 }
 0x1ad   :  { %v164_v1 = vpop.f32.mrf.mxu2 }
 0x1ae   :  { %v165_v2 = vadd.f32 %v255_v0, %v164_v1 }
 0x1b0   :  { %v231_v3 = vmul.f32 -1.442695, %v165_v2 }
 0x1b2   :  { %256 = vpow2.f32 %v231_v3 }
 0x1b5   :  { %v167_v4 = vpop.f32.mrf.mxu2 }
 0x1b6   :  { %v168_v5 = vadd.f32 %v255_v0, %v167_v4 }
 0x1b8   :  { %v257_v6 = vpop.eup %256  ;;  %v232_v7 = vmul.f32 -1.442695, %v168_v5 }
 0x1b9   :  { %v176_v8 = vadd.f32 1.0, %v257_v6 }
 0x1ba   :  { %258 = vpow2.f32 %v232_v7 }
 0x1bb   :  { %260 = vrcp.f32 %v176_v8  ;;  %v189_v14 = vand.u32 2147483648, %v176_v8  ;;  %v187_v16 = vand.u32 2147483647, %v176_v8  ;;  %vm183_vm1 = vweird.f32 %v176_v8 }
 0x1bd   :  { %v190_v19 = vor.u32 1.1754944e-38, %v189_v14  ;;  %vm188_vm3 = vcmp.eq.f32.partialorder %v187_v16, 8.507059e+37 }
 0x1c0   :  { %v259_v9 = vpop.eup %258 }
 0x1c1   :  { %v261_v10 = vpop.eup %260  ;;  %v177_v11 = vadd.f32 1.0, %v259_v9 }
 0x1c2   :  { %v179_v12 = vmul.f32 %v261_v10, %v176_v8  ;;  %vm184_vm0 = vweird.f32 %v261_v10 }
 0x1c3   :  { %262 = vrcp.f32 %v177_v11  ;;  %vm185_vm2 = vmor %vm183_vm1, %vm184_vm0  ;;  %v204_v24 = vand.u32 2147483648, %v177_v11  ;;  %v202_v26 = vand.u32 2147483647, %v177_v11  ;;  %vm198_vm5 = vweird.f32 %v177_v11 }
 0x1c4   :  { %v180_v13 = vsub.f32 1.0, %v179_v12 }
 0x1c5   :  { %v205_v28 = vor.u32 1.1754944e-38, %v204_v24  ;;  %vm203_vm7 = vcmp.eq.f32.partialorder %v202_v26, 8.507059e+37 }
 0x1c6   :  { %v181_v15 = vmul.f32 %v261_v10, %v180_v13 }
 0x1c8   :  { %v182_v17 = vadd.f32 %v261_v10, %v181_v15 }
 0x1c9   :  { %v263_v18 = vpop.eup %262 }
 0x1ca   :  { %v194_v20 = vmul.f32 %v263_v18, %v177_v11  ;;  %v186_v21 = vsel %vm185_vm2, %v261_v10, %v182_v17  ;;  %vm199_vm4 = vweird.f32 %v263_v18 }
 0x1cb   :  { %v191_v22 = vsel %vm188_vm3, %v190_v19, %v186_v21  ;;  %vm200_vm6 = vmor %vm198_vm5, %vm199_vm4 }
 0x1cc   :  { %v195_v23 = vsub.f32 1.0, %v194_v20  ;;  %208 = vst [vmem:[#allocation5] sm:$0xff] %v191_v22 }
 0x1ce   :  { %v196_v25 = vmul.f32 %v263_v18, %v195_v23 }
 0x1d0   :  { %v197_v27 = vadd.f32 %v263_v18, %v196_v25 }
 0x1d2   :  { %v201_v29 = vsel %vm200_vm6, %v263_v18, %v197_v27 }
 0x1d3   :  { %v206_v30 = vsel %vm203_vm7, %v205_v28, %v201_v29 }
 0x1d4   :  { %209 = vst [vmem:[#allocation5 + $0x8] sm:$0xff] %v206_v30 }
 0x1d5   :  { %222 = dma.vmem_to_hbm [thread:$0]  %s215_s27, 256, %s217_s30, [#allocation4], %s317_s17, %s317_s17, %s318_s18  }
 0x1d6   :  { %314 = dma.done.wait [#allocation4], 256  }
 0x1d7   :  { %315 = vsyncadd [#allocation4], 4294967040 }
 0x1d8   :  { %227 = vsyncpa [#allocation3], 1 }
 0x1d9   :  { %228 = vsyncpa [#allocation4], 1 }

</bundles_post_ra>
